<compile_context>
chip_gen: v6e
topology: v6e:2x2x1
jax: 0.10.0
libtpu: 0.0.40
codegen_flags: <defaults>
</compile_context>

<pallas_src>
import jax
import jax.numpy as jnp
from jax.experimental import pallas as pl
from jax.experimental.pallas import tpu as pltpu


def _round_up(x, m):
    return (x + m - 1) // m * m


def _pad_to(x, shape):
    if tuple(x.shape) == tuple(shape):
        return x
    return jnp.pad(x, tuple((0, t - s) for s, t in zip(x.shape, shape)))


def _vmem_limit_bytes():
    """Generation-aware scoped-VMEM limit (~0.7x physical, clamped)."""
    cap = 64 * 1024 * 1024
    try:
        info = pltpu.get_tpu_info()
        cap = int(getattr(info, "vmem_capacity_bytes", cap))
    except Exception:
        pass
    return max(32 * 1024 * 1024, min(int(0.7 * cap), 112 * 1024 * 1024))


def _auto_tiles(B, NU, D, vmem_limit, tb, tnu, resident):
    """Pick (tb, tnu, resident_table) from problem size and VMEM headroom."""
    b_pad128 = _round_up(max(B, 1), 128)
    if tb is None:
        # At least 2 batch tiles when B allows (v7x megacore), tb multiple of 128.
        tb = 128 if b_pad128 <= 128 else min(512, _round_up(b_pad128 // 2, 128))
    else:
        tb = _round_up(tb, 128)

    nu_pad128 = _round_up(max(NU, 1), 128)
    d_sub = _round_up(D, 16)                       # bf16 sublane packing
    table_bytes = 2 * d_sub * nu_pad128 * 2        # double-buffered resident U^T
    if resident is None:
        resident = table_bytes <= vmem_limit // 4

    if tnu is None:
        # Fixed per-step VMEM: double-buffered ut/vt/y/w tiles + acc + outputs.
        fixed = (2 * 2 * (_round_up(D, 8) * tb * 4)     # ut, vt (f32)
                 + 2 * 2 * (8 * tb * 4)                 # y, w   (f32, 8-sublane pad)
                 + _round_up(D, 8) * tb * 4             # acc scratch
                 + 2 * 2 * (8 * 128 * 4))               # two (1,1,128) outputs
        per_col = 2 * tb * 2                            # S tile, double-buffered bf16
        if resident:
            fixed += table_bytes
        else:
            per_col += 2 * d_sub * 2                    # streamed (D, tnu) table tile
        avail = int(vmem_limit * 0.8) - fixed
        tnu = max(128, (max(avail, 0) // max(per_col, 1)) // 128 * 128)
        tnu = min(tnu, nu_pad128, 8192)
    else:
        tnu = _round_up(tnu, 128)
    return tb, tnu, bool(resident)


def _make_kernel(tnu, resident):
    def kernel(w_ref, y_ref, ut_ref, vt_ref, s_ref, ua_ref,
               pred_ref, rel_ref, acc_ref):
        # w_ref    : VMEM (1, TB)        f32   per-row weight (1/B valid, 0 pad)
        # y_ref    : VMEM (1, TB)        f32   labels
        # ut_ref   : VMEM (D, TB)        f32   U[users]^T (lane-dense)
        # vt_ref   : VMEM (D, TB)        f32   V[items]^T
        # s_ref    : VMEM (TB, TNU)      bf16  S[users] tile
        # ua_ref   : VMEM (D, NU_pad|TNU) bf16 U^T table (resident or streamed)
        # pred_ref : VMEM (1, 1, 128)    f32   per-B-tile BCE partial (broadcast)
        # rel_ref  : VMEM (1, 1, 128)    f32   per-B-tile sum-of-squares partial
        # acc_ref  : VMEM (D, TB)        f32   (S @ U)^T accumulator scratch
        k = pl.program_id(1)
        nk = pl.num_programs(1)

        @pl.when(k == 0)
        def _init():
            acc_ref[...] = jnp.zeros_like(acc_ref)

        if resident:
            off = pl.multiple_of(k * tnu, tnu)
            ua_blk = ua_ref[:, pl.ds(off, tnu)]
        else:
            ua_blk = ua_ref[...]

        # Partial neighbour aggregation on the MXU, transposed/lane-dense:
        #   acc(D, TB) += U^T(D, TNU) . S(TB, TNU)^T   (contract on TNU, f32 acc)
        acc_ref[...] += jax.lax.dot_general(
            ua_blk, s_ref[...],
            dimension_numbers=(((1,), (1,)), ((), ())),
            preferred_element_type=jnp.float32)

        @pl.when(k == nk - 1)
        def _finalize():
            ut = ut_ref[...]
            # Social regularization term: sum((U[users] - S[users] @ U)^2).
            diff = ut - acc_ref[...]
            relation = jnp.sum(diff * diff)

            # Prediction loss (BCE with PyTorch's -100 log clamp), lane-dense.
            scores = jnp.sum(ut * vt_ref[...], axis=0, keepdims=True)
            probs = jax.nn.sigmoid(scores)
            log_p = jnp.maximum(jnp.log(probs), -100.0)
            log_1mp = jnp.maximum(jnp.log(1.0 - probs), -100.0)
            y = y_ref[...]
            bce = -(y * log_p + (1.0 - y) * log_1mp)
            pred = jnp.sum(w_ref[...] * bce)   # weights carry 1/B or 0 -> mean

            pred_ref[...] = jnp.full(pred_ref.shape, pred, dtype=pred_ref.dtype)
            rel_ref[...] = jnp.full(rel_ref.shape, relation, dtype=rel_ref.dtype)

    return kernel


def socialmf_loss(u_emb, v_emb, labels, s_rows, u_all, social_reg, *,
                  tb=None, tnu=None, resident_table=None):
    """u_emb: (B, D), v_emb: (B, D), labels: (B, 1) or (B,), s_rows: (B, NU),
    u_all: (NU, D).  Tiles auto-sized from the chip's VMEM when not given."""
    B, D = u_emb.shape
    NU = u_all.shape[0]
    f32, bf16 = jnp.float32, jnp.bfloat16

    vmem_limit = _vmem_limit_bytes()
    tb, tnu, resident = _auto_tiles(B, NU, D, vmem_limit, tb, tnu, resident_table)

    b_pad = _round_up(B, tb)
    nu_pad = _round_up(NU, tnu)
    nb = b_pad // tb
    nk = nu_pad // tnu

    # Padded / transposed operands.  Padded batch rows contribute 0 to both
    # terms (weight 0 for BCE; zero trust row and zero U^T column => zero diff);
    # padded NU columns of S are zero so the contraction ignores them.
    ut_p = _pad_to(u_emb.T.astype(f32), (D, b_pad))
    vt_p = _pad_to(v_emb.T.astype(f32), (D, b_pad))
    y_p = _pad_to(labels.reshape(1, -1).astype(f32), (1, b_pad))
    w_p = _pad_to(jnp.full((1, B), 1.0 / B, f32), (1, b_pad))
    s_p = _pad_to(s_rows.astype(bf16), (b_pad, nu_pad))
    ua_t = _pad_to(u_all.T.astype(bf16), (D, nu_pad))

    if resident:
        # Fetched once for the whole grid (constant index_map).
        ua_spec = pl.BlockSpec((D, nu_pad), lambda b, k: (0, 0))
    else:
        # Streamed per reduction step; costs nb * NU * D * 2 extra HBM bytes
        # (small: D is small) but bounds VMEM on v7x.
        ua_spec = pl.BlockSpec((D, tnu), lambda b, k: (0, k))

    cost = pl.CostEstimate(
        flops=2 * b_pad * nu_pad * D + 8 * b_pad * D + 12 * b_pad,
        transcendentals=3 * b_pad,
        bytes_accessed=(s_p.size * 2
                        + ua_t.size * 2 * (1 if resident else nb)
                        + (ut_p.size + vt_p.size + y_p.size + w_p.size) * 4
                        + nb * 2 * 128 * 4),
    )

    pred_part, rel_part = pl.pallas_call(
        _make_kernel(tnu, resident),
        out_shape=(jax.ShapeDtypeStruct((nb, 1, 128), f32),
                   jax.ShapeDtypeStruct((nb, 1, 128), f32)),
        grid_spec=pltpu.PrefetchScalarGridSpec(
            num_scalar_prefetch=0,
            grid=(nb, nk),
            in_specs=[
                pl.BlockSpec((1, tb), lambda b, k: (0, b)),     # weights (1/B or 0)
                pl.BlockSpec((1, tb), lambda b, k: (0, b)),     # labels
                pl.BlockSpec((D, tb), lambda b, k: (0, b)),     # U[users]^T
                pl.BlockSpec((D, tb), lambda b, k: (0, b)),     # V[items]^T
                pl.BlockSpec((tb, tnu), lambda b, k: (b, k)),   # S[users] tile
                ua_spec,                                        # U^T table
            ],
            out_specs=[pl.BlockSpec((1, 1, 128), lambda b, k: (b, 0, 0)),
                       pl.BlockSpec((1, 1, 128), lambda b, k: (b, 0, 0))],
            scratch_shapes=[pltpu.VMEM((D, tb), jnp.float32)],
        ),
        compiler_params=pltpu.CompilerParams(
            dimension_semantics=("parallel", "arbitrary"),
            vmem_limit_bytes=vmem_limit,
        ),
        cost_estimate=cost,
    )(w_p, y_p, ut_p, vt_p, s_p, ua_t)

    pred_loss = jnp.sum(pred_part[:, 0, 0])
    relation = jnp.sum(rel_part[:, 0, 0])
    return pred_loss + social_reg * relation


def socialmf_loss_ref(u_emb, v_emb, labels, s_rows, u_all, social_reg):
    scores = jnp.sum(u_emb * v_emb, axis=-1)
    probs = jax.nn.sigmoid(scores)
    log_p = jnp.maximum(jnp.log(probs), -100.0)
    log_1mp = jnp.maximum(jnp.log(1.0 - probs), -100.0)
    y = labels.reshape(-1)
    pred_loss = jnp.mean(-(y * log_p + (1.0 - y) * log_1mp))
    diff = u_emb - s_rows @ u_all
    return pred_loss + social_reg * jnp.sum(diff * diff)


if __name__ == "__main__":
    # Synthetic SocialMF "model" parameters (deterministic, small).
    NUM_USERS, NUM_ITEMS, D, B = 300, 150, 32, 200
    key = jax.random.PRNGKey(0)
    k_u, k_v, k_s, k_users, k_items, k_lab = jax.random.split(key, 6)

    U = jax.random.normal(k_u, (NUM_USERS, D), dtype=jnp.float32) * 0.1    # user embeddings
    V = jax.random.normal(k_v, (NUM_ITEMS, D), dtype=jnp.float32) * 0.1    # item embeddings
    # Row-normalized social trust matrix S (each user's neighbour weights sum to 1).
    S_raw = jax.random.uniform(k_s, (NUM_USERS, NUM_USERS), dtype=jnp.float32)
    S = S_raw / jnp.sum(S_raw, axis=-1, keepdims=True)

    users = jax.random.randint(k_users, (B,), 0, NUM_USERS)
    items = jax.random.randint(k_items, (B,), 0, NUM_ITEMS)
    labels = jax.random.bernoulli(k_lab, 0.5, (B, 1)).astype(jnp.float32)
    social_reg = 0.1

    # Plain-JAX glue: embedding / trust-row gathers ("model lookup").
    u_emb = jnp.take(U, users, axis=0)     # [B, D]
    v_emb = jnp.take(V, items, axis=0)     # [B, D]
    s_rows = jnp.take(S, users, axis=0)    # [B, NUM_USERS]

    ref = socialmf_loss_ref(u_emb, v_emb, labels, s_rows, U, social_reg)

    # Auto-sized path (generation-aware VMEM budget, nb >= 2, resident U^T here).
    loss = jax.block_until_ready(
        socialmf_loss(u_emb, v_emb, labels, s_rows, U, social_reg))
    assert jnp.allclose(loss, ref, rtol=5e-3, atol=5e-3), (loss, ref)

    # Small explicit tiles: exercises a multi-step NU reduction and the streamed
    # (per-k) U^T table path.
    loss2 = jax.block_until_ready(
        socialmf_loss(u_emb, v_emb, labels, s_rows, U, social_reg,
                      tb=128, tnu=128, resident_table=False))
    assert jnp.allclose(loss2, ref, rtol=5e-3, atol=5e-3), (loss2, ref)

    print("KERNEL_OK")
</pallas_src>

<mosaic_0001>
module attributes {stable_mosaic.version = 11 : i64} {
  func.func @kernel(%arg0: i32, %arg1: i32, %arg2: memref<1x128xf32, #tpu.memory_space<vmem>>, %arg3: memref<1x128xf32, #tpu.memory_space<vmem>>, %arg4: memref<32x128xf32, #tpu.memory_space<vmem>>, %arg5: memref<32x128xf32, #tpu.memory_space<vmem>>, %arg6: memref<128x384xbf16, #tpu.memory_space<vmem>>, %arg7: memref<32x384xbf16, #tpu.memory_space<vmem>>, %arg8: memref<1x1x128xf32, #tpu.memory_space<vmem>>, %arg9: memref<1x1x128xf32, #tpu.memory_space<vmem>>, %arg10: memref<32x128xf32, #tpu.memory_space<vmem>>) attributes {dimension_semantics = [#tpu.dimension_semantics<parallel>, #tpu.dimension_semantics<arbitrary>], iteration_bounds = array<i64: 2, 1>, scalar_prefetch = 0 : i64, scratch_operands = 1 : i64, tpu.core_type = #tpu.core_type<tc>, window_params = [{transform_indices = @transform_0, window_bounds = array<i64: 1, 128>}, {transform_indices = @transform_1, window_bounds = array<i64: 1, 128>}, {transform_indices = @transform_2, window_bounds = array<i64: 32, 128>}, {transform_indices = @transform_3, window_bounds = array<i64: 32, 128>}, {transform_indices = @transform_4, window_bounds = array<i64: 128, 384>}, {pipeline_mode = #tpu.pipeline_mode<synchronous>, transform_indices = @transform_5, window_bounds = array<i64: 32, 384>}, {transform_indices = @transform_6, window_bounds = array<i64: 1, 1, 128>}, {transform_indices = @transform_7, window_bounds = array<i64: 1, 1, 128>}]} {
    %c0_i32 = arith.constant 0 : i32
    %0 = arith.cmpi eq, %arg1, %c0_i32 : i32
    %1 = arith.extui %0 : i1 to i32
    %c0_i32_0 = arith.constant 0 : i32
    %2 = arith.cmpi ne, %1, %c0_i32_0 : i32
    scf.if %2 {
      %cst_9 = arith.constant 0.000000e+00 : f32
      %15 = vector.broadcast %cst_9 : f32 to vector<32x128xf32>
      %c0_10 = arith.constant 0 : index
      %c0_11 = arith.constant 0 : index
      %16 = vector.load %arg10[%c0_10, %c0_11] : memref<32x128xf32, #tpu.memory_space<vmem>>, vector<32x128xf32>
      tpu.vector_store %arg10[%c0_10, %c0_11], %15 {strides = array<i32>} : memref<32x128xf32, #tpu.memory_space<vmem>>, vector<32x128xf32>,
    } else {
    }
    %c384_i32 = arith.constant 384 : i32
    %3 = arith.muli %arg1, %c384_i32 : i32
    %4 = tpu.assume_multiple %3, 384 : i32
    %c0 = arith.constant 0 : index
    %5 = arith.index_cast %4 : i32 to index
    %6 = vector.load %arg7[%c0, %5] : memref<32x384xbf16, #tpu.memory_space<vmem>>, vector<32x384xbf16>
    %c0_1 = arith.constant 0 : index
    %c0_2 = arith.constant 0 : index
    %7 = vector.load %arg10[%c0_1, %c0_2] : memref<32x128xf32, #tpu.memory_space<vmem>>, vector<32x128xf32>
    %c0_3 = arith.constant 0 : index
    %c0_4 = arith.constant 0 : index
    %8 = vector.load %arg6[%c0_3, %c0_4] : memref<128x384xbf16, #tpu.memory_space<vmem>>, vector<128x384xbf16>
    %cst = arith.constant dense<0.000000e+00> : vector<32x128xf32>
    %9 = tpu.matmul %6, %8, %cst {dimension_numbers = #tpu.dot_dimension_numbers<[1], [1], [0], [0], [0, 0, 1, 0], [], []>} : vector<32x384xbf16>, vector<128x384xbf16>, vector<32x128xf32> -> vector<32x128xf32>
    %10 = arith.addf %7, %9 : vector<32x128xf32>
    %c0_5 = arith.constant 0 : index
    %c0_6 = arith.constant 0 : index
    %11 = vector.load %arg10[%c0_5, %c0_6] : memref<32x128xf32, #tpu.memory_space<vmem>>, vector<32x128xf32>
    tpu.vector_store %arg10[%c0_5, %c0_6], %10 {strides = array<i32>} : memref<32x128xf32, #tpu.memory_space<vmem>>, vector<32x128xf32>,
    %c0_i32_7 = arith.constant 0 : i32
    %12 = arith.cmpi eq, %arg1, %c0_i32_7 : i32
    %13 = arith.extui %12 : i1 to i32
    %c0_i32_8 = arith.constant 0 : i32
    %14 = arith.cmpi ne, %13, %c0_i32_8 : i32
    scf.if %14 {
      %c0_9 = arith.constant 0 : index
      %c0_10 = arith.constant 0 : index
      %15 = vector.load %arg4[%c0_9, %c0_10] : memref<32x128xf32, #tpu.memory_space<vmem>>, vector<32x128xf32>
      %c0_11 = arith.constant 0 : index
      %c0_12 = arith.constant 0 : index
      %16 = vector.load %arg10[%c0_11, %c0_12] : memref<32x128xf32, #tpu.memory_space<vmem>>, vector<32x128xf32>
      %17 = arith.subf %15, %16 : vector<32x128xf32>
      %18 = arith.mulf %17, %17 : vector<32x128xf32>
      %19 = vector.shape_cast %18 : vector<32x128xf32> to vector<1x32x128xf32>
      %cst_13 = arith.constant dense<0.000000e+00> : vector<1xf32>
      %20 = vector.multi_reduction <add>, %19, %cst_13 [1, 2] : vector<1x32x128xf32> to vector<1xf32>
      %21 = vector.shape_cast %20 : vector<1xf32> to vector<1x1x1xf32>
      %22 = vector.extract %21[0, 0, 0] : f32 from vector<1x1x1xf32>
      %c0_14 = arith.constant 0 : index
      %c0_15 = arith.constant 0 : index
      %23 = vector.load %arg5[%c0_14, %c0_15] : memref<32x128xf32, #tpu.memory_space<vmem>>, vector<32x128xf32>
      %24 = arith.mulf %15, %23 : vector<32x128xf32>
      %cst_16 = arith.constant dense<0.000000e+00> : vector<128xf32>
      %25 = vector.multi_reduction <add>, %24, %cst_16 [0] : vector<32x128xf32> to vector<128xf32>
      %26 = vector.shape_cast %25 : vector<128xf32> to vector<1x128xf32>
      %27 = arith.negf %26 : vector<1x128xf32>
      %28 = math.exp %27 : vector<1x128xf32>
      %cst_17 = arith.constant 1.000000e+00 : f32
      %29 = vector.broadcast %cst_17 : f32 to vector<1x128xf32>
      %30 = arith.addf %29, %28 : vector<1x128xf32>
      %31 = arith.divf %29, %30 : vector<1x128xf32>
      %32 = math.log %31 : vector<1x128xf32>
      %cst_18 = arith.constant -1.000000e+02 : f32
      %33 = vector.broadcast %cst_18 : f32 to vector<1x128xf32>
      %34 = arith.maximumf %32, %33 : vector<1x128xf32>
      %cst_19 = arith.constant 1.000000e+00 : f32
      %35 = vector.broadcast %cst_19 : f32 to vector<1x128xf32>
      %36 = arith.subf %35, %31 : vector<1x128xf32>
      %37 = math.log %36 : vector<1x128xf32>
      %cst_20 = arith.constant -1.000000e+02 : f32
      %38 = vector.broadcast %cst_20 : f32 to vector<1x128xf32>
      %39 = arith.maximumf %37, %38 : vector<1x128xf32>
      %c0_21 = arith.constant 0 : index
      %c0_22 = arith.constant 0 : index
      %40 = vector.load %arg3[%c0_21, %c0_22] : memref<1x128xf32, #tpu.memory_space<vmem>>, vector<1x128xf32>
      %41 = arith.mulf %40, %34 : vector<1x128xf32>
      %cst_23 = arith.constant 1.000000e+00 : f32
      %42 = vector.broadcast %cst_23 : f32 to vector<1x128xf32>
      %43 = arith.subf %42, %40 : vector<1x128xf32>
      %44 = arith.mulf %43, %39 : vector<1x128xf32>
      %45 = arith.addf %41, %44 : vector<1x128xf32>
      %cst_24 = arith.constant 0.000000e+00 : f32
      %46 = vector.broadcast %cst_24 : f32 to vector<1x128xf32>
      %47 = arith.subf %46, %45 : vector<1x128xf32>
      %c0_25 = arith.constant 0 : index
      %c0_26 = arith.constant 0 : index
      %48 = vector.load %arg2[%c0_25, %c0_26] : memref<1x128xf32, #tpu.memory_space<vmem>>, vector<1x128xf32>
      %49 = arith.mulf %48, %47 : vector<1x128xf32>
      %50 = vector.shape_cast %49 : vector<1x128xf32> to vector<1x1x128xf32>
      %cst_27 = arith.constant dense<0.000000e+00> : vector<1xf32>
      %51 = vector.multi_reduction <add>, %50, %cst_27 [1, 2] : vector<1x1x128xf32> to vector<1xf32>
      %52 = vector.shape_cast %51 : vector<1xf32> to vector<1x1x1xf32>
      %53 = vector.extract %52[0, 0, 0] : f32 from vector<1x1x1xf32>
      %54 = vector.broadcast %53 : f32 to vector<1x1x128xf32>
      %c0_28 = arith.constant 0 : index
      %c0_29 = arith.constant 0 : index
      %c0_30 = arith.constant 0 : index
      %55 = vector.load %arg8[%c0_28, %c0_29, %c0_30] : memref<1x1x128xf32, #tpu.memory_space<vmem>>, vector<1x1x128xf32>
      tpu.vector_store %arg8[%c0_28, %c0_29, %c0_30], %54 {strides = array<i32>} : memref<1x1x128xf32, #tpu.memory_space<vmem>>, vector<1x1x128xf32>,
      %56 = vector.broadcast %22 : f32 to vector<1x1x128xf32>
      %c0_31 = arith.constant 0 : index
      %c0_32 = arith.constant 0 : index
      %c0_33 = arith.constant 0 : index
      %57 = vector.load %arg9[%c0_31, %c0_32, %c0_33] : memref<1x1x128xf32, #tpu.memory_space<vmem>>, vector<1x1x128xf32>
      tpu.vector_store %arg9[%c0_31, %c0_32, %c0_33], %56 {strides = array<i32>} : memref<1x1x128xf32, #tpu.memory_space<vmem>>, vector<1x1x128xf32>,
    } else {
    }
    return
  }
  func.func @transform_0(%arg0: i32, %arg1: i32) -> (i32, i32) {
    %c0_i32 = arith.constant 0 : i32
    %c0_i32_0 = arith.constant 0 : i32
    return %c0_i32, %arg0 : i32, i32
  }
  func.func @transform_1(%arg0: i32, %arg1: i32) -> (i32, i32) {
    %c0_i32 = arith.constant 0 : i32
    %c0_i32_0 = arith.constant 0 : i32
    return %c0_i32, %arg0 : i32, i32
  }
  func.func @transform_2(%arg0: i32, %arg1: i32) -> (i32, i32) {
    %c0_i32 = arith.constant 0 : i32
    %c0_i32_0 = arith.constant 0 : i32
    return %c0_i32, %arg0 : i32, i32
  }
  func.func @transform_3(%arg0: i32, %arg1: i32) -> (i32, i32) {
    %c0_i32 = arith.constant 0 : i32
    %c0_i32_0 = arith.constant 0 : i32
    return %c0_i32, %arg0 : i32, i32
  }
  func.func @transform_4(%arg0: i32, %arg1: i32) -> (i32, i32) {
    %c0_i32 = arith.constant 0 : i32
    return %arg0, %arg1 : i32, i32
  }
  func.func @transform_5(%arg0: i32, %arg1: i32) -> (i32, i32) {
    %c0_i32 = arith.constant 0 : i32
    %c0_i32_0 = arith.constant 0 : i32
    %c0_i32_1 = arith.constant 0 : i32
    return %c0_i32, %c0_i32_0 : i32, i32
  }
  func.func @transform_6(%arg0: i32, %arg1: i32) -> (i32, i32, i32) {
    %c0_i32 = arith.constant 0 : i32
    %c0_i32_0 = arith.constant 0 : i32
    %c0_i32_1 = arith.constant 0 : i32
    return %arg0, %c0_i32, %c0_i32_0 : i32, i32, i32
  }
  func.func @transform_7(%arg0: i32, %arg1: i32) -> (i32, i32, i32) {
    %c0_i32 = arith.constant 0 : i32
    %c0_i32_0 = arith.constant 0 : i32
    %c0_i32_1 = arith.constant 0 : i32
    return %arg0, %c0_i32, %c0_i32_0 : i32, i32, i32
  }
}

</mosaic_0001>

<bundles_post_ra>
// kernel: tpu_custom_call.1
= control target key start
LH: loop header
LB: loop body
LE: loop exit
PB: predicated region body
PF: predicated region fallthrough
CT: control target
= control target key end

     0   :  { %s2052_s0 = inlined_call_operand.hbm [shape: f32[1,256], index: 0, kind: input, shape index: {}]   ;;  %s2053_s1 = inlined_call_operand.hbm [shape: f32[1,256], index: 1, kind: input, shape index: {}]   ;;  %s2054_s2 = inlined_call_operand.hbm [shape: f32[32,256], index: 2, kind: input, shape index: {}]   ;;  %s2055_s3 = inlined_call_operand.hbm [shape: f32[32,256], index: 3, kind: input, shape index: {}]   ;;  %s2056_s4 = inlined_call_operand.hbm [shape: bf16[256,384], index: 4, kind: input, shape index: {}]   ;;  %s2057_s5 = inlined_call_operand.hbm [shape: bf16[32,384], index: 5, kind: input, shape index: {}]   ;;  %s2058_s6 = inlined_call_operand.hbm [shape: f32[2,1,128], index: 6, kind: output, shape index: {0}]   ;;  %s2059_s7 = inlined_call_operand.hbm [shape: f32[2,1,128], index: 7, kind: output, shape index: {1}]  }
   0x1   :  { %2074 = sst [smem:[#allocation27_spill]] %s2052_s0 }
   0x2   :  { %2075 = sst [smem:[#allocation28_spill]] %s2053_s1 }
   0x3   :  { %2076 = sst [smem:[#allocation29_spill]] %s2054_s2 }
   0x4   :  { %2077 = sst [smem:[#allocation30_spill]] %s2055_s3 }
   0x5   :  { %2078 = sst [smem:[#allocation31_spill]] %s2057_s5 }
   0x6   :  { %2079 = sst [smem:[#allocation32_spill]] %s2058_s6 }
   0x7   :  { %2080 = sst [smem:[#allocation33_spill]] %s2059_s7 }
   0x8   :  { %13 = vsyncpa [#allocation4], 0 }
   0x9   :  { %15 = vsyncpa [#allocation4 + $0x1], 0 }
   0xa   :  { %16 = vsyncpa [#allocation7], 0 }
   0xb   :  { %18 = vsyncpa [#allocation7 + $0x1], 0 }
   0xc   :  { %19 = vsyncpa [#allocation10], 0 }
   0xd   :  { %21 = vsyncpa [#allocation10 + $0x1], 0 }
   0xe   :  { %22 = vsyncpa [#allocation13], 0 }
   0xf   :  { %23 = vsyncpa [#allocation5], 0 }
  0x10   :  { %25 = vsyncpa [#allocation5 + $0x1], 0 }
  0x11   :  { %26 = vsyncpa [#allocation16], 0 }
  0x12   :  { %28 = vsyncpa [#allocation16 + $0x1], 0  ;;  %s1699_s24 = smov 0   ;;  %s1701_s25 = smov 0  }
  0x13   :  { %s1703_s26 = smov 0   ;;  %s1705_s27 = smov 0  }
  0x14   :  { %s1707_s28 = smov 0   ;;  %s1709_s29 = smov 0  }
  0x15 LB: > { %2081 = sst [smem:[#allocation23_spill]] %s1632_s26  ;;  %s46_s30 = sadd.s32 1, %s1640_s28  ;;  %s1644_s29 = sphi %s1709_s29, %s34_s29   ;;  %s1640_s28 = sphi %s1707_s28, %s2119_s28   ;;  %s1636_s27 = sphi %s1705_s27, %s2118_s27   ;;  %s1632_s26 = sphi %s1703_s26, %s2114_s26   ;;  %s1628_s25 = sphi %s1701_s25, %s2117_s25   ;;  %s1624_s24 = sphi %s1699_s24, %s2116_s24  }
  0x16   : > { %2082 = sst [smem:[#allocation24_spill]] %s1644_s29  ;;  %s53_s8 = sadd.s32 1, %s1632_s26 }
  0x17   : > { %p48_p0 = scmp.ge.s32.totalorder %s46_s30, 2  ;;  %p60_p1 = scmp.ne.s32.totalorder %s1632_s26, %s1628_s25 }
  0x18   : > { %p61_p2 = scmp.eq.s32.totalorder %s1644_s29, 0  ;;  %p1251_p5 = scmp.lt.s32.totalorder %s1644_s29, 2 }
  0x19   : > { %s2121_s30 = smov (%p48_p0, %s46_s30), 0  ;;  %s1744_s10 = sand.u32 1, %s1632_s26  }
  0x1a   : > { %2083 = sst [smem:[#allocation25_spill]] %s2121_s30  ;;  %p62_p4 = por %p61_p2, %p60_p1 }
  0x1b   : > { %s50_s9 = ssub.s32 %s1640_s28, %s2121_s30  ;;  %s2060_s11 = sshll.u32 %s1640_s28, 4 }
  0x1c   : > { %p51_p6 = scmp.eq.s32.totalorder %s50_s9, 0  ;;  %p1747_p7 = pnand %p1251_p5, %p62_p4 }
  0x1d   : > { %s2061_s13 = sand.u32 1, %s1644_s29   ;;  %s2086_s1 = sld [smem:[#allocation28_spill]] }
  0x1e   : > { %s1753_s14 = scalar_select %p51_p6, %s1632_s26, %s53_s8  }
  0x1f   : > { %s302_s18 = scalar_lea.vmem [#allocation6], %s1744_s10  ;;  %s1122_s20 = sshll.u32 %s1744_s10, 5 }
  0x20   : > { %2085 = sst [smem:[#allocation26_spill]] %s1753_s14  ;;  %s309_s19 = sshll.u32 %s302_s18, 4  ;;  %s310_s19 = int_to_ptr.vmem [resolvable:$true] %s309_s19 }
  0x21   : > { %s1764_s21 = scalar_lea.sflag [#allocation7], %s2061_s13  ;;  %p1768_p8 = pneg %p1747_p7 }
  0x22   : > { %s1369_s23 = scalar_lea.vmem %s310_s19, 16  ;;  %s1646_s8 = smov [#allocation6]  }
  0x23   : > { %s307_s17 = scalar_lea.hbm %s2086_s1, %s2060_s11  ;;  %p1370_p9 = scmp.ne.s32.totalorder %s310_s19, %s1369_s23 }
  0x24   : > { %s1374_s9 = sshll.u32 %s1646_s8, 4  ;;  %s1375_s9 = int_to_ptr.vmem [resolvable:$false] %s1374_s9 }
  0x25   : > { %p1372_p10 = pnand %p1370_p9, %p1768_p8  ;;  %s1376_s15 = scalar_lea.vmem %s1375_s9, 32 }
  0x26   : > { %p1377_p12 = scmp.lt.s32.totalorder %s310_s19, %s1375_s9  ;;  %p1378_p13 = scmp.lt.s32.totalorder %s1376_s15, %s1369_s23 }
  0x27   : > { %p1373_p11 = pneg %p1372_p10 }
  0x28   : > { %p1379_p0 = por %p1378_p13, %p1377_p12 }
  0x2a   : > { %p1380_p2 = pnand %p1379_p0, %p1373_p11 }
  0x2c   : > { %1383 = shalt.err (!%p1380_p2)
}
  0x2d   : > { %1233 = dma.hbm_to_vmem [thread:$0]  (!%p1747_p7), %s307_s17, 16, %s310_s19, %s1764_s21  }
  0x2e   : > { %s1123_s16 = sshll.u32 %s1640_s28, 7  ;;  %s2088_s2 = sld [smem:[#allocation29_spill]] }
  0x2f   : > { %s320_s8 = scalar_lea.vmem [#allocation8], %s1122_s20  ;;  %s2089_s3 = sld [smem:[#allocation30_spill]] }
  0x30   : > { %s326_s1 = sshll.u32 %s320_s8, 4  ;;  %s340_s30 = scalar_lea.vmem [#allocation9], %s1122_s20  ;;  %s1783_s1 = int_to_ptr.vmem [resolvable:$true] %s326_s1 }
  0x31   : > { %s346_s14 = sshll.u32 %s340_s30, 4  ;;  %s2090_s6 = sand.u32 1, %s1644_s29   ;;  %s347_s14 = int_to_ptr.vmem [resolvable:$true] %s346_s14 }
  0x32   : > { %s1790_s7 = scalar_lea.sflag [#allocation10], %s2090_s6  ;;  %s1397_s17 = scalar_lea.vmem %s347_s14, 512 }
  0x33   : > { %p1398_p4 = scmp.ne.s32.totalorder %s347_s14, %s1397_s17  ;;  %s1647_s11 = smov [#allocation9]  }
  0x34   : > { %s1781_s13 = scalar_lea.hbm %s2088_s2, %s1123_s16  ;;  %s1402_s19 = sshll.u32 %s1647_s11, 4  ;;  %s1403_s19 = int_to_ptr.vmem [resolvable:$false] %s1402_s19 }
  0x35   : > { %s345_s15 = scalar_lea.hbm %s2089_s3, %s1123_s16  ;;  %p1400_p5 = pnand %p1398_p4, %p1768_p8 }
  0x36   : > { %s1404_s18 = scalar_lea.vmem %s1403_s19, 1024  ;;  %p1405_p9 = scmp.lt.s32.totalorder %s347_s14, %s1403_s19 }
  0x37   : > { %p1401_p6 = pneg %p1400_p5  ;;  %p1406_p10 = scmp.lt.s32.totalorder %s1404_s18, %s1397_s17 }
  0x39   : > { %p1407_p11 = por %p1406_p10, %p1405_p9 }
  0x3b   : > { %p1408_p12 = pnand %p1407_p11, %p1401_p6 }
  0x3d   : > { %1411 = shalt.err (!%p1408_p12)
}
  0x3e   : > { %s2065_s20 = smov 256   ;;  %s2066_s6 = smov 128  }
  0x3f   : > { %s2067_s30 = smov 8   ;;  %s1801_s16 = sadd.s32 4294967295, %s1644_s29  }
  0x40   : > { %1239 = dma.hbm_to_vmem [thread:$0]  (!%p1747_p7), %s345_s15, 512, %s347_s14, %s1790_s7, %s2065_s20, %s2066_s6, %s2067_s30  }
  0x41   : > { %s1116_s8 = sadd.s32 4294967294, %s1644_s29   ;;  %p66_p13 = scmp.ne.s32.totalorder %s1628_s25, %s1624_s24 }
  0x42   : > { %p67_p0 = scmp.eq.s32.totalorder %s1801_s16, 0  ;;  %p217_p2 = scmp.eq.s32.totalorder %s1801_s16, 1 }
  0x43   : > { %p223_p4 = scmp.eq.s32.totalorder %s1116_s8, 1  ;;  %p1117_p6 = scmp.ge.s32.totalorder %s1644_s29, 1 }
  0x44   : > { %p1810_p5 = por %p67_p0, %p66_p13  ;;  %p1818_p9 = por %p217_p2, %p60_p1 }
  0x45   : > { %p1822_p10 = por %p223_p4, %p66_p13  ;;  %p256_p11 = scmp.lt.s32.totalorder %s1644_s29, 3 }
  0x46   : > { %s2092_s14 = scalar_select %p1818_p9, 1, 0 }
  0x47   : > { %s2093_s9 = scalar_select %p1822_p10, 1, 0 }
  0x48   : > { %p1827_p12 = pnand %p1117_p6, %p256_p11  ;;  %s1651_s17 = smov [#allocation12]  }
  0x49   : > { %s268_s11 = sshll.u32 %s1651_s17, 4  ;;  %s2095_s19 = sshll.u32 %s1640_s28, 4  ;;  %s269_s11 = int_to_ptr.vmem [resolvable:$true] %s268_s11 }
  0x4a   : > { %p1223_p3 = pneg %p1827_p12  ;;  %s2096_s0 = sld [smem:[#allocation27_spill]] }
  0x4b   : > { %s285_s30 = scalar_lea.vmem [#allocation3], %s1744_s10  ;;  %s1423_s26 = scalar_lea.vmem %s269_s11, 768 }
  0x4c   : > { %p1842_p1 = pnand %p1223_p3, %p67_p0  ;;  %s292_s2 = sshll.u32 %s285_s30, 4  ;;  %s1847_s2 = int_to_ptr.vmem [resolvable:$true] %s292_s2 }
  0x4d   : > { %p1424_p2 = scmp.ne.s32.totalorder %s269_s11, %s1423_s26  ;;  %p1431_p11 = scmp.lt.s32.totalorder %s269_s11, %s269_s11 }
  0x4e   : > { %p1414_p13 = pneg %p1842_p1  ;;  %p1432_p10 = scmp.lt.s32.totalorder %s1423_s26, %s1423_s26 }
  0x50   : > { %s1838_s20 = scalar_lea.hbm %s2096_s0, %s2095_s19  ;;  %p1426_p4 = pnand %p1424_p2, %p1414_p13 }
  0x51   : > { %p1433_p9 = por %p1432_p10, %p1431_p11 }
  0x52   : > { %p1427_p6 = pneg %p1426_p4 }
  0x54   : > { %p1434_p3 = pnand %p1433_p9, %p1427_p6 }
  0x56   : > { %1437 = shalt.err (!%p1434_p3)
}
  0x57   : > { %s2072_s19 = smov 192   ;;  %s2073_s30 = smov 12  }
  0x58   : > { %s2098_s5 = sld [smem:[#allocation31_spill]]  ;;  %s283_s26 = scalar_lea.sflag [#allocation4], %s1744_s10 }
  0x59   : > { %s1451_s17 = scalar_lea.vmem %s1847_s2, 16  ;;  %s1654_s3 = smov [#allocation3]  }
  0x5a   : > { %p1452_p9 = scmp.ne.s32.totalorder %s1847_s2, %s1451_s17  ;;  %s1456_s0 = sshll.u32 %s1654_s3, 4  ;;  %s1457_s0 = int_to_ptr.vmem [resolvable:$false] %s1456_s0 }
  0x5b   : > { %s1458_s29 = scalar_lea.vmem %s1457_s0, 32  ;;  %p1459_p2 = scmp.lt.s32.totalorder %s1847_s2, %s1457_s0 }
  0x5c   : > { %p1454_p10 = pnand %p1452_p9, %p1768_p8  ;;  %p1460_p4 = scmp.lt.s32.totalorder %s1458_s29, %s1451_s17 }
  0x5e   : > { %1226 = dma.hbm_to_vmem [thread:$0]  (!%p1842_p1), %s2098_s5, 768, %s269_s11, [#allocation13], %s2072_s19, %s2072_s19, %s2073_s30  }
  0x5f   : > { %p1455_p13 = pneg %p1454_p10  ;;  %p1461_p6 = por %p1460_p4, %p1459_p2 }
  0x61   : > { %p1462_p11 = pnand %p1461_p6, %p1455_p13 }
  0x63   : > { %1465 = shalt.err (!%p1462_p11)
}
  0x64   : > { %1230 = dma.hbm_to_vmem [thread:$0]  (!%p1747_p7), %s1838_s20, 16, %s1847_s2, %s283_s26  }
  0x65   : > { %s1479_s6 = scalar_lea.vmem %s1783_s1, 512  ;;  %s1655_s3 = smov [#allocation8]  }
  0x66   : > { %p1480_p1 = scmp.ne.s32.totalorder %s1783_s1, %s1479_s6  ;;  %s1484_s0 = sshll.u32 %s1655_s3, 4  ;;  %s1485_s0 = int_to_ptr.vmem [resolvable:$false] %s1484_s0 }
  0x67   : > { %s1486_s29 = scalar_lea.vmem %s1485_s0, 1024  ;;  %p1487_p10 = scmp.lt.s32.totalorder %s1783_s1, %s1485_s0 }
  0x68   : > { %p1482_p3 = pnand %p1480_p1, %p1768_p8  ;;  %p1488_p13 = scmp.lt.s32.totalorder %s1486_s29, %s1479_s6 }
  0x6a   : > { %p1483_p9 = pneg %p1482_p3  ;;  %p1489_p2 = por %p1488_p13, %p1487_p10 }
  0x6c   : > { %p1490_p4 = pnand %p1489_p2, %p1483_p9 }
  0x6e   : > { %1493 = shalt.err (!%p1490_p4)
}
  0x6f   : > { %s2099_s11 = smov 8   ;;  %s2100_s17 = smov 128  }
  0x70   : > { %s2101_s18 = smov 256   ;;  %s2102_s2 = smul.u32 3072, %s1640_s28 }
  0x71   : > { %1236 = dma.hbm_to_vmem [thread:$0]  (!%p1747_p7), %s1781_s13, 512, %s1783_s1, %s1764_s21, %s2101_s18, %s2100_s17, %s2099_s11  }
  0x72   : > { %s369_s26 = scalar_lea.hbm %s2056_s4, %s2102_s2  ;;  %s2103_s6 = smul.u32 192, %s1744_s10 }
  0x73   : > { %s1656_s19 = smov [#allocation11]  }
  0x74   : > { %s360_s3 = scalar_lea.vmem [#allocation11], %s2103_s6  ;;  %s1512_s30 = sshll.u32 %s1656_s19, 4  ;;  %s1513_s30 = int_to_ptr.vmem [resolvable:$false] %s1512_s30 }
  0x75   : > { %s370_s0 = sshll.u32 %s360_s3, 4  ;;  %s1514_s5 = scalar_lea.vmem %s1513_s30, 6144  ;;  %s371_s0 = int_to_ptr.vmem [resolvable:$true] %s370_s0 }
  0x76   : > { %s1507_s29 = scalar_lea.vmem %s371_s0, 3072  ;;  %p1515_p3 = scmp.lt.s32.totalorder %s371_s0, %s1513_s30 }
  0x77   : > { %p1508_p6 = scmp.ne.s32.totalorder %s371_s0, %s1507_s29  ;;  %p1516_p9 = scmp.lt.s32.totalorder %s1514_s5, %s1507_s29 }
  0x79   : > { %p1510_p11 = pnand %p1508_p6, %p1768_p8  ;;  %p1517_p10 = por %p1516_p9, %p1515_p3 }
  0x7b   : > { %p1511_p1 = pneg %p1510_p11 }
  0x7d   : > { %p1518_p13 = pnand %p1517_p10, %p1511_p1 }
  0x7f   : > { %1521 = shalt.err (!%p1518_p13)
}
  0x80   : > { %s2104_s1 = smov 12   ;;  %s2105_s10 = smov 192  }
  0x81   : > { %1242 = dma.hbm_to_vmem [thread:$0]  (!%p1747_p7), %s369_s26, 3072, %s371_s0, %s1790_s7, %s2105_s10, %s2105_s10, %s2104_s1  }
  0x82   : > { %382 = sbr.rel (%p1827_p12) target bundleno = 661 (0x295), region = 44  ;;  %s1902_s13 = sand.u32 (!%p1827_p12), 1, %s1628_s25  }
  0x83   : > { %s385_s5 = scalar_lea.sflag (!%p1827_p12), [#allocation4], %s1902_s13  ;;  %s387_s21 = scalar_lea.vmem (!%p1827_p12), [#allocation3], %s1902_s13 }
  0x87   : > { %1599 = dma.done.wait (%p1810_p5), %s385_s5, 16  }
  0x88   : > { %1601 = vsyncadd (%p1810_p5), %s385_s5, 4294967280  ;;  %s392_s7 = sand.u32 1, %s1801_s16   ;;  %s395_s22 = scalar_lea.vmem [#allocation6], %s1902_s13 }
  0x89   : > { %s393_s12 = scalar_lea.sflag [#allocation7], %s392_s7 }
  0x8a   : > { %1603 = dma.done.wait (%p1810_p5), %s393_s12, 528  }
  0x8b   : > { %1605 = vsyncadd (%p1810_p5), %s393_s12, 4294966768  ;;  %s1130_s15 = sshll.u32 %s1902_s13, 5  ;;  %s410_s30 = scalar_lea.sflag [#allocation10], %s392_s7 }
  0x8c   : > { %s1917_s19 = scalar_lea.vmem [#allocation8], %s1130_s15  ;;  %s1919_s11 = scalar_lea.vmem [#allocation9], %s1130_s15 }
  0x8d   : > { %1607 = dma.done.wait (%p1810_p5), %s410_s30, 3584  }
  0x8e   : > { %1609 = vsyncadd (%p1810_p5), %s410_s30, 4294963712  ;;  %s1200_s17 = smul.u32 192, %s1902_s13 }
  0x90   : > { %s1926_s18 = scalar_lea.vmem [#allocation11], %s1200_s17 }
  0x91   : > { %1611 = dma.done.wait (%p67_p0), [#allocation13], 768  }
  0x92   : > { %1613 = vsyncadd (%p67_p0), [#allocation13], 4294966528  ;;  %v1308_v0 = vld [vmem:[%s1926_s18 + $0xac] ss:$12 sps:$4 sm:$0xff]   ;;  %v1310_v1 = vld [vmem:[%s1926_s18 + $0xb0] ss:$12 sps:$4 sm:$0xff]  }
  0x93   : > { %698 = vmatprep.subr.bf16.mxu0 %v1308_v0  ;;  %v1311_v2 = vld [vmem:[%s1926_s18 + $0xa8] ss:$12 sps:$4 sm:$0xff]   ;;  %1178 = vmatprep.subr.bf16.mxu1 %v1310_v1  ;;  %v1314_v4 = vld [vmem:[%s1926_s18 + $0x98] ss:$12 sps:$4 sm:$0xff]   ;;  %v1315_v5 = vld [vmem:[%s1926_s18 + $0x90] ss:$12 sps:$4 sm:$0xff]  }
  0x94   : > { %v1312_v3 = vld [vmem:[%s1926_s18 + $0x94] ss:$12 sps:$4 sm:$0xff]   ;;  %699 = vmatpush1.bf16.xpose.msra.mxu0 %v1311_v2  ;;  %1179 = vmatpush3.bf16.xpose.msra.mxu1 %v1310_v1  ;;  %v1316_v6 = vld [vmem:[%s1926_s18 + $0x7c] ss:$12 sps:$4 sm:$0xff]   ;;  %v1319_v8 = vld [vmem:[%s1926_s18 + $0x78] ss:$12 sps:$4 sm:$0xff]  }
  0x95   : > { %700 = vmatprep.subr.bf16.mxu0 %v1312_v3  ;;  %1180 = vmatprep.subr.bf16.mxu1 %v1314_v4  ;;  %v1318_v7 = vld [vmem:[%s1926_s18 + $0x80] ss:$12 sps:$4 sm:$0xff]   ;;  %v1320_v9 = vld [vmem:[%s1926_s18 + $0x64] ss:$12 sps:$4 sm:$0xff]   ;;  %v1322_v10 = vld [vmem:[%s1926_s18 + $0x68] ss:$12 sps:$4 sm:$0xff]  }
  0x96   : > { %v1342_v11 = vld [vmem:[#allocation12 + $0x4] ss:$12 sps:$4 sm:$0xff]   ;;  %v1343_v12 = vld [vmem:[#allocation12 + $0x8] ss:$12 sps:$4 sm:$0xff]   ;;  %v1323_v13 = vld [vmem:[%s1926_s18 + $0x60] ss:$12 sps:$4 sm:$0xff]  }
  0x97   : > { %730 = vmatprep.mubr.bf16.mxu0 %v1342_v11  ;;  %1194 = vmatprep.mubr.bf16.mxu1 %v1343_v12  ;;  %v1324_v14 = vld [vmem:[%s1926_s18 + $0x4c] ss:$12 sps:$4 sm:$0xff]   ;;  %v1326_v15 = vld [vmem:[%s1926_s18 + $0x50] ss:$12 sps:$4 sm:$0xff]   ;;  %v1327_v16 = vld [vmem:[%s1926_s18 + $0x48] ss:$12 sps:$4 sm:$0xff]  }
  0x98   : > { %v1328_v17 = vld [vmem:[%s1926_s18 + $0x34] ss:$12 sps:$4 sm:$0xff]   ;;  %v1330_v18 = vld [vmem:[%s1926_s18 + $0x38] ss:$12 sps:$4 sm:$0xff]   ;;  %v1331_v19 = vld [vmem:[%s1926_s18 + $0x30] ss:$12 sps:$4 sm:$0xff]  }
  0x99   : > { %v1332_v20 = vld [vmem:[%s1926_s18 + $0x1c] ss:$12 sps:$4 sm:$0xff]   ;;  %v1334_v21 = vld [vmem:[%s1926_s18 + $0x20] ss:$12 sps:$4 sm:$0xff]   ;;  %v1335_v22 = vld [vmem:[%s1926_s18 + $0x18] ss:$12 sps:$4 sm:$0xff]  }
  0x9a   : > { %v1336_v23 = vld [vmem:[%s1926_s18 + $0x4] ss:$12 sps:$4 sm:$0xff]   ;;  %v1338_v24 = vld [vmem:[%s1926_s18 + $0x8] ss:$12 sps:$4 sm:$0xff]   ;;  %v1339_v25 = vld [vmem:[%s1926_s18] ss:$12 sps:$4 sm:$0xff]  }
  0x9b   : > { %v1340_v26 = vld [vmem:[#allocation12] ss:$12 sps:$4 sm:$0xff]   ;;  %v1345_v28 = vld [vmem:[#allocation12 + $0x1c] ss:$12 sps:$4 sm:$0xff]   ;;  %v1347_v29 = vld [vmem:[#allocation12 + $0x18] ss:$12 sps:$4 sm:$0xff]  }
  0x9c   : > { %701 = vmatpush1.bf16.xpose.msra.mxu0 %v1315_v5  ;;  %1181 = vmatpush3.bf16.xpose.msra.mxu1 %v1314_v4  ;;  %v1344_v27 = vld [vmem:[#allocation12 + $0x20] ss:$12 sps:$4 sm:$0xff]   ;;  %v809_v36 = vld [vmem:[%s1917_s19 + $0x10] sm:$0xff]  ;;  %v810_v40 = vld [vmem:[%s1917_s19 + $0x18] sm:$0xff]  ;;  %vm873_vm0 = vcmask 1040384   ;;  %s1164_s16 = sshll.u32 %s1636_s27, 4 }
  0x9d   : > { %702 = vmatprep.subr.bf16.mxu0 %v1316_v6  ;;  %1182 = vmatprep.subr.bf16.mxu1 %v1318_v7  ;;  %v807_v30 = vld [vmem:[%s1917_s19] sm:$0xff]  ;;  %v808_v32 = vld [vmem:[%s1917_s19 + $0x8] sm:$0xff]  ;;  %v837_v37 = vld [vmem:[%s1919_s11 + $0x10] sm:$0xff]  ;;  %s477_s23 = scalar_lea.vmem [#allocation15], %s1902_s13  ;;  %s471_s20 = scalar_lea.vmem [#allocation14], %s1902_s13 }
  0x9e   : > { %v835_v31 = vld [vmem:[%s1919_s11] sm:$0xff]  ;;  %v836_v33 = vld [vmem:[%s1919_s11 + $0x8] sm:$0xff]  ;;  %v841_v39 = vmul.f32 %v837_v37, %v809_v36  ;;  %v838_v41 = vld [vmem:[%s1919_s11 + $0x18] sm:$0xff]  ;;  %s918_s2 = sshll.u32 %s477_s23, 4  ;;  %s905_s8 = sshll.u32 %s471_s20, 4  ;;  %s1980_s2 = int_to_ptr.vmem [resolvable:$true] %s918_s2  ;;  %s1982_s8 = int_to_ptr.vmem [resolvable:$true] %s905_s8 }
  0x9f   : > { %v839_v34 = vmul.f32 %v835_v31, %v807_v30  ;;  %v840_v35 = vmul.f32 %v836_v33, %v808_v32  ;;  %v842_v43 = vmul.f32 %v838_v41, %v810_v40  ;;  %v865_v60 = vld [vmem:[%s395_s22] sm:$0x1]  ;;  %s2106_s3 = sld [smem:[#allocation33_spill]]  ;;  %s893_s1 = scalar_lea.sflag [#allocation16], %s1902_s13 }
  0xa0   : > { %v867_v3 = vsub.f32 1.0, %v865_v60  ;;  %s1522_s10 = scalar_lea.vmem %s1980_s2, 16  ;;  %p2107_p8 = scmp.ne.s32.totalorder %s2092_s14, 0 }
  0xa1   : > { %v843_v38 = vadd.f32 %v840_v35, %v839_v34  ;;  %p1523_p7 = scmp.ne.s32.totalorder %s1980_s2, %s1522_s10  ;;  %s1657_s5 = smov [#allocation15]  }
  0xa3   : > { %v844_v42 = vadd.f32 %v843_v38, %v841_v39  ;;  %p1524_p0 = pnand %p1523_p7, %p2107_p8 }
  0xa4   : > { %703 = vmatpush1.bf16.xpose.msra.mxu0 %v1319_v8  ;;  %1183 = vmatpush3.bf16.xpose.msra.mxu1 %v1318_v7 }
  0xa5   : > { %704 = vmatprep.subr.bf16.mxu0 %v1320_v9  ;;  %1184 = vmatprep.subr.bf16.mxu1 %v1322_v10  ;;  %v845_v44 = vadd.f32 %v844_v42, %v842_v43  ;;  %s1978_s0 = scalar_lea.hbm %s2106_s3, %s1164_s16  ;;  %p1525_p5 = pneg %p1524_p0 }
  0xa7   : > { %v846_v45 = vrot.slane %v845_v44, 4 }
  0xa9   : > { %v847_v46 = vadd.f32 %v846_v45, %v845_v44 }
  0xab   : > { %v848_v47 = vrot.slane %v847_v46, 2 }
  0xac   : > { %705 = vmatpush1.bf16.xpose.msra.mxu0 %v1323_v13  ;;  %1185 = vmatpush3.bf16.xpose.msra.mxu1 %v1322_v10 }
  0xad   : > { %706 = vmatprep.subr.bf16.mxu0 %v1324_v14  ;;  %1186 = vmatprep.subr.bf16.mxu1 %v1326_v15  ;;  %v849_v48 = vadd.f32 %v848_v47, %v847_v46 }
  0xaf   : > { %v850_v49 = vrot.slane %v849_v48, 1 }
  0xb1   : > { %v851_v50 = vadd.f32 %v850_v49, %v849_v48 }
  0xb3   : > { %v1163_v51 = vmul.f32 -1.442695, %v851_v50 }
  0xb4   : > { %707 = vmatpush1.bf16.xpose.msra.mxu0 %v1327_v16  ;;  %1187 = vmatpush3.bf16.xpose.msra.mxu1 %v1326_v15 }
  0xb5   : > { %708 = vmatprep.subr.bf16.mxu0 %v1328_v17  ;;  %1188 = vmatprep.subr.bf16.mxu1 %v1330_v18  ;;  %1348 = vpow2.f32 %v1163_v51 }
  0xbc   : > { %709 = vmatpush1.bf16.xpose.msra.mxu0 %v1331_v19  ;;  %1189 = vmatpush3.bf16.xpose.msra.mxu1 %v1330_v18 }
  0xbd   : > { %710 = vmatprep.subr.bf16.mxu0 %v1332_v20  ;;  %1190 = vmatprep.subr.bf16.mxu1 %v1334_v21 }
  0xc2   : > { %v1349_v52 = vpop.eup %1348 }
  0xc3   : > { %v855_v53 = vadd.f32 1.0, %v1349_v52 }
  0xc4   : > { %711 = vmatpush1.bf16.xpose.msra.mxu0 %v1335_v22  ;;  %1191 = vmatpush3.bf16.xpose.msra.mxu1 %v1334_v21 }
  0xc5   : > { %712 = vmatprep.subr.bf16.mxu0 %v1336_v23  ;;  %1192 = vmatprep.subr.bf16.mxu1 %v1338_v24  ;;  %1350 = vrcp.f32 %v855_v53 }
  0xcc   : > { %713 = vmatpush1.bf16.xpose.msra.mxu0 %v1339_v25  ;;  %1193 = vmatpush3.bf16.xpose.msra.mxu1 %v1338_v24 }
  0xd2   : > { %v1351_v54 = vpop.eup %1350 }
  0xd3   : > { %731 = vmatmul.mubr.bf16.vlgmr.msra.gmra.mxu0 %v1340_v26  ;;  %1195 = vmatmul.mubr.bf16.vlgmr.msra.gmra.mxu1 %v1344_v27  ;;  %v861_v55 = vsub.f32 1.0, %v1351_v54  ;;  %1352 = vlog2.f32 %v1351_v54 }
  0xd4   : > { %738 = vmatprep.mubr.bf16.mxu0 %v1345_v28  ;;  %v871_v28 = vld [vmem:[%s387_s21] sm:$0x1]  ;;  %s1526_s21 = sshll.u32 %s1657_s5, 4  ;;  %s1527_s21 = int_to_ptr.vmem [resolvable:$false] %s1526_s21 }
  0xd5   : > { %1354 = vlog2.f32 %v861_v55  ;;  %s1528_s7 = scalar_lea.vmem %s1527_s21, 32  ;;  %p1529_p12 = scmp.lt.s32.totalorder %s1980_s2, %s1527_s21 }
  0xd6   : > { %p1530_p2 = scmp.lt.s32.totalorder %s1528_s7, %s1522_s10 }
  0xd8   : > { %p1531_p4 = por %p1530_p2, %p1529_p12 }
  0xda   : > { %p1532_p6 = pnand %p1531_p4, %p1525_p5 }
  0xdb   : > { %739 = vmatmul.mubr.bf16.gmra.mxu0 %v1347_v29 }
  0xe0   : > { %v1353_v56 = vpop.eup %1352 }
  0xe1   : > { %v859_v58 = vmul.f32 0.6931472, %v1353_v56 }
  0xe2   : > { %v1355_v57 = vpop.eup %1354 }
  0xe3   : > { %v863_v59 = vmul.f32 0.6931472, %v1355_v57  ;;  %v860_v1 = vmax.f32 %v859_v58, -100.0 }
  0xe5   : > { %v864_v2 = vmax.f32 %v863_v59, -100.0  ;;  %v866_v9 = vmul.f32 %v865_v60, %v860_v1 }
  0xe7   : > { %v868_v10 = vmul.f32 %v867_v3, %v864_v2 }
  0xe9   : > { %v869_v17 = vadd.f32 %v868_v10, %v866_v9 }
  0xeb   : > { %v870_v26 = vsub.f32 0.0, %v869_v17 }
  0xed   : > { %v872_v31 = vmul.f32 %v871_v28, %v870_v26 }
 0x193   : > { %v732_v61 = vpop.f32.mrf.mxu0  ;;  %v1196_v62 = vpop.f32.mrf.mxu1 }
 0x195   : > { %v734_v63 = vpop.f32.mrf.mxu0  ;;  %v781_v0 = vpop.f32.mrf.mxu1 }
 0x196   : > { %v782_v4 = vadd.f32 %v781_v0, %v732_v61 }
 0x197   : > { %v735_v5 = vpop.f32.mrf.mxu0  ;;  %v1197_v6 = vpop.f32.mrf.mxu1 }
 0x198   : > { %v815_v11 = vsub.f32 %v807_v30, %v782_v4 }
 0x199   : > { %v737_v7 = vpop.f32.mrf.mxu0  ;;  %v784_v8 = vpop.f32.mrf.mxu1 }
 0x19a   : > { %v785_v12 = vadd.f32 %v784_v8, %v735_v5  ;;  %v819_v18 = vmul.f32 %v815_v11, %v815_v11 }
 0x19b   : > { %v740_v13 = vpop.f32.mrf.mxu0 }
 0x19c   : > { %v816_v14 = vsub.f32 %v808_v32, %v785_v12  ;;  %v790_v15 = vadd.f32 %v1196_v62, %v740_v13  ;;  %v874_v32 = vsel %vm873_vm0, %v872_v31, 0.0 }
 0x19d   : > { %v742_v16 = vpop.f32.mrf.mxu0 }
 0x19e   : > { %v820_v19 = vmul.f32 %v816_v14, %v816_v14  ;;  %v817_v20 = vsub.f32 %v809_v36, %v790_v15 }
 0x19f   : > { %v743_v21 = vpop.f32.mrf.mxu0 }
 0x1a0   : > { %v821_v22 = vmul.f32 %v817_v20, %v817_v20  ;;  %v793_v23 = vadd.f32 %v1197_v6, %v743_v21  ;;  %v823_v24 = vadd.f32 %v820_v19, %v819_v18 }
 0x1a1   : > { %v745_v25 = vpop.f32.mrf.mxu0 }
 0x1a2   : > { %v818_v27 = vsub.f32 %v810_v40, %v793_v23  ;;  %v824_v30 = vadd.f32 %v823_v24, %v821_v22 }
 0x1a4   : > { %v822_v29 = vmul.f32 %v818_v27, %v818_v27 }
 0x1a6   : > { %v825_v33 = vadd.f32 %v824_v30, %v822_v29 }
 0x1a8   : > { %826 = vadd.xlane.f32.xlu0 %v825_v33 }
 0x1ac   : > { %875 = vadd.xlane.f32.xlu0 %v874_v32 }
 0x231   : > { %v827_v34 = vpop.xlane.xlu0 %826 }
 0x232   : > { %v828_v35 = vrot.slane %v827_v34, 4 }
 0x234   : > { %v829_v36 = vadd.f32 %v828_v35, %v827_v34 }
 0x235   : > { %v876_v37 = vpop.xlane.xlu0 %875 }
 0x236   : > { %v830_v38 = vrot.slane %v829_v36, 2  ;;  %v877_v39 = vrot.slane %v876_v37, 4 }
 0x238   : > { %v878_v40 = vadd.f32 %v877_v39, %v876_v37  ;;  %v831_v41 = vadd.f32 %v830_v38, %v829_v36 }
 0x23a   : > { %v879_v42 = vrot.slane %v878_v40, 2  ;;  %v832_v43 = vrot.slane %v831_v41, 1 }
 0x23c   : > { %v880_v44 = vadd.f32 %v879_v42, %v878_v40  ;;  %v833_v45 = vadd.f32 %v832_v43, %v831_v41 }
 0x23e   : > { %1201 = vpush %v833_v45  ;;  %v881_v46 = vrot.slane %v880_v44, 1 }
 0x240   : > { %v882_v47 = vadd.f32 %v881_v46, %v880_v44 }
 0x242   : > { %1203 = vpush %v882_v47 }
 0x26f   : > { %s1202_s29 = spop %1201 }
 0x270   : > { %v886_v48 = vstv %s1202_s29 }
 0x271   : > { %887 = vst [vmem:[%s477_s23] sm:$0x1] %v886_v48 }
 0x272   : > { %1535 = shalt.err (!%p1532_p6)
}
 0x273   : > { %s1536_s12 = scalar_lea.hbm %s1978_s0, 16  ;;  %s1540_s19 = scalar_lea.hbm %s2106_s3, 32 }
 0x274   : > { %p1537_p11 = scmp.ne.s32.totalorder %s1978_s0, %s1536_s12  ;;  %p1541_p9 = scmp.lt.s32.totalorder %s1978_s0, %s2106_s3 }
 0x275   : > { %p1542_p10 = scmp.lt.s32.totalorder %s1540_s19, %s1536_s12 }
 0x276   : > { %p1538_p1 = pnand %p1537_p11, %p2107_p8 }
 0x277   : > { %p1543_p13 = por %p1542_p10, %p1541_p9 }
 0x278   : > { %p1539_p3 = pneg %p1538_p1 }
 0x27a   : > { %p1544_p7 = pnand %p1543_p13, %p1539_p3 }
 0x27c   : > { %1547 = shalt.err (!%p1544_p7)
}
 0x27d   : > { %1220 = dma.vmem_to_hbm [thread:$0]  (%p2107_p8), %s1980_s2, 16, %s1978_s0, %s893_s1  }
 0x27e   : > { %s1204_s17 = spop %1203  ;;  %s2108_s26 = sld [smem:[#allocation32_spill]] }
 0x27f   : > { %v884_v49 = vstv %s1204_s17  ;;  %s889_s10 = scalar_lea.sflag [#allocation5], %s1902_s13  ;;  %s1548_s5 = scalar_lea.vmem %s1982_s8, 16 }
 0x280   : > { %885 = vst [vmem:[%s471_s20] sm:$0x1] %v884_v49  ;;  %p1549_p0 = scmp.ne.s32.totalorder %s1982_s8, %s1548_s5  ;;  %s1658_s21 = smov [#allocation14]  }
 0x281   : > { %s1552_s7 = sshll.u32 %s1658_s21, 4  ;;  %s1553_s7 = int_to_ptr.vmem [resolvable:$false] %s1552_s7 }
 0x282   : > { %p1550_p5 = pnand %p1549_p0, %p2107_p8  ;;  %s1554_s12 = scalar_lea.vmem %s1553_s7, 32 }
 0x283   : > { %p1555_p2 = scmp.lt.s32.totalorder %s1982_s8, %s1553_s7  ;;  %p1556_p4 = scmp.lt.s32.totalorder %s1554_s12, %s1548_s5 }
 0x284   : > { %s2109_s6 = smov %s2108_s26  ;;  %s903_s29 = scalar_lea.hbm %s2108_s26, %s1164_s16 }
 0x285   : > { %p1551_p12 = pneg %p1550_p5  ;;  %p1557_p6 = por %p1556_p4, %p1555_p2 }
 0x287   : > { %p1558_p11 = pnand %p1557_p6, %p1551_p12 }
 0x289   : > { %1561 = shalt.err (!%p1558_p11)
}
 0x28a   : > { %s1562_s27 = scalar_lea.hbm %s903_s29, 16  ;;  %s1566_s2 = scalar_lea.hbm %s2109_s6, 32 }
 0x28b   : > { %p1563_p1 = scmp.ne.s32.totalorder %s903_s29, %s1562_s27  ;;  %p1567_p10 = scmp.lt.s32.totalorder %s903_s29, %s2109_s6 }
 0x28c   : > { %p1568_p13 = scmp.lt.s32.totalorder %s1566_s2, %s1562_s27 }
 0x28d   : > { %p1564_p3 = pnand %p1563_p1, %p2107_p8 }
 0x28e   : > { %p1569_p7 = por %p1568_p13, %p1567_p10 }
 0x28f   : > { %p1565_p9 = pneg %p1564_p3 }
 0x291   : > { %p1570_p0 = pnand %p1569_p7, %p1565_p9 }
 0x293   : > { %1573 = shalt.err (!%p1570_p0)
}
 0x294   : > { %1219 = dma.vmem_to_hbm [thread:$0]  (%p2107_p8), %s1982_s8, 16, %s903_s29, %s889_s10  }
 0x295 PF: > { %s2110_s1 = sld [smem:[#allocation24_spill]]  ;;  %s930_s22 = sand.u32 1, %s1624_s24  }
 0x296   : > { %p2111_p5 = scmp.ne.s32.totalorder %s2093_s9, 0  ;;  %s931_s15 = scalar_lea.sflag [#allocation5], %s930_s22 }
 0x29b   : > { %p2112_p12 = scmp.ge.s32.totalorder %s2110_s1, 2 }
 0x29d   : > { %p1244_p2 = pnand %p2112_p12, %p2111_p5 }
 0x29f   : > { %p1245_p4 = pneg %p1244_p2 }
 0x2a1   : > { %1615 = dma.done.wait (%p1245_p4), %s931_s15, 16  }
 0x2a2   : > { %1617 = vsyncadd (%p1245_p4), %s931_s15, 4294967280  ;;  %s939_s19 = scalar_lea.sflag [#allocation16], %s930_s22 }
 0x2a3   : > { %1619 = dma.done.wait (%p1245_p4), %s939_s19, 16  }
 0x2a4   : > { %1621 = vsyncadd (%p1245_p4), %s939_s19, 4294967280  ;;  %s34_s29 = sadd.s32 1, %s2110_s1   ;;  %s2113_s14 = sld [smem:[#allocation23_spill]] }
 0x2a5   : > { %p31_p6 = scmp.ge.s32.totalorder %s34_s29, 4   ;;  %s2114_s26 = sld [smem:[#allocation26_spill]] }
 0x2a6   : > { %s2115_s8 = sld [smem:[#allocation25_spill]]  ;;  %s2116_s24 = smov %s1628_s25 }
 0x2a7   : > { %s2118_s27 = smov %s1640_s28 }
 0x2a8   :  { %33 = sbr.rel (!%p31_p6) target bundleno = 21 (0x15), region = 167 }
 0x2aa   : > { %s2117_s25 = smov %s2113_s14 }
 0x2ac   : > { %s2119_s28 = smov %s2115_s8 }
 0x2ad   :  { %943 = vsyncpa [#allocation4], 1 }
 0x2ae   :  { %945 = vsyncpa [#allocation4 + $0x1], 1 }
 0x2af   :  { %946 = vsyncpa [#allocation7], 1 }
 0x2b0   :  { %948 = vsyncpa [#allocation7 + $0x1], 1 }
 0x2b1   :  { %949 = vsyncpa [#allocation10], 1 }
 0x2b2   :  { %951 = vsyncpa [#allocation10 + $0x1], 1 }
 0x2b3   :  { %952 = vsyncpa [#allocation13], 1 }
 0x2b4   :  { %953 = vsyncpa [#allocation5], 1 }
 0x2b5   :  { %955 = vsyncpa [#allocation5 + $0x1], 1 }
 0x2b6   :  { %956 = vsyncpa [#allocation16], 1 }
 0x2b7   :  { %958 = vsyncpa [#allocation16 + $0x1], 1 }

</bundles_post_ra>
